<compile_context>
chip_gen: v7x
topology: tpu7x:2x2x1
jax: 0.10.0
libtpu: 0.0.40
codegen_flags: <defaults>
</compile_context>

<pallas_src>
import functools

import jax
import jax.numpy as jnp
from jax.experimental import pallas as pl
from jax.experimental.pallas import tpu as pltpu


_VMEM_LIMIT_BYTES = 48 * 1024 * 1024      # well above defaults, below v7x 64 MiB physical
_BLOCK_BUDGET_BYTES = 24 * 1024 * 1024    # 2 (dbl-buffer) * 2 (in+out) * block <= this


def _choose_tiles(N, C, HW, itemsize):
    """Pick (batch_tile, hw_tile) so 4 * block_bytes stays under the VMEM budget."""
    max_block_bytes = _BLOCK_BUDGET_BYTES // 4
    row_bytes = C * itemsize

    # HW tile: full extent if it fits; otherwise the largest 128-multiple divisor of
    # HW that fits (the last block dim must be a 128-multiple or the full dim).
    hw_t = HW
    if HW * row_bytes > max_block_bytes:
        best = 0
        t = 128
        while t < HW:
            if HW % t == 0 and t * row_bytes <= max_block_bytes:
                best = t
            t += 128
        # Fallback: no 128-multiple divisor of HW -> keep full HW (limit is raised).
        hw_t = best if best > 0 else HW

    # Batch tile: largest divisor of N that keeps the block under budget
    # (amortizes the ~0.35 us per-grid-step overhead when C*HW is small).
    bn = 1
    for cand in range(2, N + 1):
        if N % cand == 0 and cand * hw_t * row_bytes <= max_block_bytes:
            bn = cand
    return bn, hw_t


def _pool_excite_kernel(x_ref, w1t_ref, b1_ref, w2t_ref, b2_ref,
                        attn_ref, acc_ref, *, inv_hw):
    """Pass 1: accumulate spatial sum; run the excitation once at the last HW tile."""
    h_idx = pl.program_id(1)

    @pl.when(h_idx == 0)
    def _():
        acc_ref[...] = jnp.zeros_like(acc_ref)

    # Partial sum over this HW chunk; accumulate in f32 (supports bf16 x).
    # The cast feeds straight into the reduce -- no full-tile copy stays live.
    acc_ref[...] += jnp.sum(x_ref[...].astype(jnp.float32), axis=-1, keepdims=True)

    @pl.when(h_idx == pl.num_programs(1) - 1)
    def _():
        pooled = acc_ref[...][:, :, 0] * inv_hw                        # (BN, C) f32
        h = jnp.dot(pooled, w1t_ref[...],
                    preferred_element_type=jnp.float32) + b1_ref[...]  # (BN, C_mid)
        h = jnp.maximum(h, 0.0)
        a = jnp.dot(h, w2t_ref[...],
                    preferred_element_type=jnp.float32) + b2_ref[...]  # (BN, C)
        a = jnp.clip(a + 3.0, 0.0, 6.0) * (1.0 / 6.0)                  # HSigmoid
        attn_ref[...] = a[:, :, None]                                  # (BN, C, 1)


def _scale_kernel(x_ref, a_ref, o_ref):
    """Pass 2: o = x * attn (per-channel broadcast along the HW lanes)."""
    a = a_ref[...]                                                     # (BN, C, 1) f32
    o_ref[...] = (x_ref[...].astype(jnp.float32) * a).astype(o_ref.dtype)


def se_block(x, w1, b1, w2, b2):
    """x: (N, C, H, W) f32 or bf16. w1: (C_mid, C), w2: (C, C_mid). Returns (N, C, H, W)."""
    N, C, H, W = x.shape
    C_mid = w1.shape[0]
    assert w1.shape[1] == C and w2.shape[0] == C, \
        "SEBlock requires out_channels == in_channels for x * attn"
    HW = H * W
    itemsize = x.dtype.itemsize
    BN, HW_T = _choose_tiles(N, C, HW, itemsize)
    n_b, n_hw = N // BN, HW // HW_T

    x3 = x.reshape(N, C, HW)
    w1t = w1.T                      # (C, C_mid)
    w2t = w2.T                      # (C_mid, C)
    b1r = b1.reshape(1, C_mid)
    b2r = b2.reshape(1, C)

    cparams = pltpu.CompilerParams(
        dimension_semantics=("parallel", "arbitrary"),
        vmem_limit_bytes=_VMEM_LIMIT_BYTES)

    # ---- Pass 1: global average pool + excitation -> attn (N, C, 1) f32 ----
    attn = pl.pallas_call(
        functools.partial(_pool_excite_kernel, inv_hw=1.0 / HW),
        out_shape=jax.ShapeDtypeStruct((N, C, 1), jnp.float32),
        grid_spec=pltpu.PrefetchScalarGridSpec(
            num_scalar_prefetch=0,
            grid=(n_b, n_hw),
            in_specs=[
                pl.BlockSpec((BN, C, HW_T), lambda n, h: (n, 0, h)),
                pl.BlockSpec((C, C_mid), lambda n, h: (0, 0)),
                pl.BlockSpec((1, C_mid), lambda n, h: (0, 0)),
                pl.BlockSpec((C_mid, C), lambda n, h: (0, 0)),
                pl.BlockSpec((1, C), lambda n, h: (0, 0)),
            ],
            out_specs=pl.BlockSpec((BN, C, 1), lambda n, h: (n, 0, 0)),
            scratch_shapes=[pltpu.VMEM((BN, C, 1), jnp.float32)],
        ),
        compiler_params=cparams,
        cost_estimate=pl.CostEstimate(
            flops=N * C * HW + 4 * N * C * C_mid,
            transcendentals=0,
            bytes_accessed=N * C * HW * itemsize + N * C * 4
                           + 2 * C * C_mid * 4 + (C + C_mid) * 4),
    )(x3, w1t, b1r, w2t, b2r)

    # ---- Pass 2: out = x * attn, both grid axes parallel (megacore on v7x) ----
    out = pl.pallas_call(
        _scale_kernel,
        out_shape=jax.ShapeDtypeStruct((N, C, HW), x.dtype),
        grid_spec=pltpu.PrefetchScalarGridSpec(
            num_scalar_prefetch=0,
            grid=(n_b, n_hw),
            in_specs=[
                pl.BlockSpec((BN, C, HW_T), lambda n, h: (n, 0, h)),
                pl.BlockSpec((BN, C, 1), lambda n, h: (n, 0, 0)),
            ],
            out_specs=pl.BlockSpec((BN, C, HW_T), lambda n, h: (n, 0, h)),
        ),
        compiler_params=pltpu.CompilerParams(
            dimension_semantics=("parallel", "parallel"),
            vmem_limit_bytes=_VMEM_LIMIT_BYTES),
        cost_estimate=pl.CostEstimate(
            flops=N * C * HW,
            transcendentals=0,
            bytes_accessed=2 * N * C * HW * itemsize + N * C * 4),
    )(x3, attn)
    return out.reshape(N, C, H, W)


def _reference(x, w1, b1, w2, b2):
    pooled = jnp.mean(x, axis=(2, 3), keepdims=True)                       # (N,C,1,1)
    h = jnp.einsum("mc,nchw->nmhw", w1, pooled) + b1[None, :, None, None]
    h = jnp.maximum(h, 0.0)
    a = jnp.einsum("cm,nmhw->nchw", w2, h) + b2[None, :, None, None]
    a = jnp.clip(a + 3.0, 0.0, 6.0) / 6.0
    return x * a


if __name__ == "__main__":
    # Module config: in_channels == out_channels (required for x * attn), ratio = 4
    N, C, H, W = 2, 8, 16, 16
    ratio = 4
    C_mid = C // ratio

    key = jax.random.PRNGKey(0)
    kx, k1, kb1, k2, kb2 = jax.random.split(key, 5)
    x = jax.random.normal(kx, (N, C, H, W), dtype=jnp.float32)
    # Deterministic synthetic parameters (1x1 convs -> plain matrices)
    w1 = 0.1 * jax.random.normal(k1, (C_mid, C), dtype=jnp.float32)
    b1 = 0.1 * jax.random.normal(kb1, (C_mid,), dtype=jnp.float32)
    w2 = 0.1 * jax.random.normal(k2, (C, C_mid), dtype=jnp.float32)
    b2 = 0.1 * jax.random.normal(kb2, (C,), dtype=jnp.float32)

    se = jax.jit(se_block)

    # f32 path
    out = se(x, w1, b1, w2, b2)
    jax.block_until_ready(out)
    ref = _reference(x, w1, b1, w2, b2)
    assert jnp.allclose(out, ref, atol=1e-5, rtol=1e-5), "f32 mismatch vs reference"

    # bf16 I/O path (pool / excitation still accumulate in f32)
    xb = x.astype(jnp.bfloat16)
    out_b = se(xb, w1, b1, w2, b2)
    jax.block_until_ready(out_b)
    ref_b = _reference(xb.astype(jnp.float32), w1, b1, w2, b2)
    assert jnp.allclose(out_b.astype(jnp.float32), ref_b, atol=3e-2, rtol=3e-2), \
        "bf16 mismatch vs reference"

    print("KERNEL_OK")
</pallas_src>

<mosaic_0001>
module attributes {stable_mosaic.version = 11 : i64} {
  func.func @_scale_kernel(%arg0: i32, %arg1: i32, %arg2: memref<2x8x256xf32, #tpu.memory_space<vmem>>, %arg3: memref<2x8x1xf32, #tpu.memory_space<vmem>>, %arg4: memref<2x8x256xf32, #tpu.memory_space<vmem>>) attributes {dimension_semantics = [#tpu.dimension_semantics<parallel>, #tpu.dimension_semantics<parallel>], iteration_bounds = array<i64: 1, 1>, scalar_prefetch = 0 : i64, scratch_operands = 0 : i64, tpu.core_type = #tpu.core_type<tc>, window_params = [{transform_indices = @transform_0, window_bounds = array<i64: 2, 8, 256>}, {transform_indices = @transform_1, window_bounds = array<i64: 2, 8, 1>}, {transform_indices = @transform_2, window_bounds = array<i64: 2, 8, 256>}]} {
    %c0 = arith.constant 0 : index
    %c0_0 = arith.constant 0 : index
    %c0_1 = arith.constant 0 : index
    %0 = vector.load %arg3[%c0, %c0_0, %c0_1] : memref<2x8x1xf32, #tpu.memory_space<vmem>>, vector<2x8x1xf32>
    %c0_2 = arith.constant 0 : index
    %c0_3 = arith.constant 0 : index
    %c0_4 = arith.constant 0 : index
    %1 = vector.load %arg2[%c0_2, %c0_3, %c0_4] : memref<2x8x256xf32, #tpu.memory_space<vmem>>, vector<2x8x256xf32>
    %2 = vector.broadcast %0 : vector<2x8x1xf32> to vector<2x8x256xf32>
    %3 = arith.mulf %1, %2 : vector<2x8x256xf32>
    %c0_5 = arith.constant 0 : index
    %c0_6 = arith.constant 0 : index
    %c0_7 = arith.constant 0 : index
    %4 = vector.load %arg4[%c0_5, %c0_6, %c0_7] : memref<2x8x256xf32, #tpu.memory_space<vmem>>, vector<2x8x256xf32>
    tpu.vector_store %arg4[%c0_5, %c0_6, %c0_7], %3 {strides = array<i32>} : memref<2x8x256xf32, #tpu.memory_space<vmem>>, vector<2x8x256xf32>,
    return
  }
  func.func @transform_0(%arg0: i32, %arg1: i32) -> (i32, i32, i32) {
    %c0_i32 = arith.constant 0 : i32
    %c0_i32_0 = arith.constant 0 : i32
    return %arg0, %c0_i32, %arg1 : i32, i32, i32
  }
  func.func @transform_1(%arg0: i32, %arg1: i32) -> (i32, i32, i32) {
    %c0_i32 = arith.constant 0 : i32
    %c0_i32_0 = arith.constant 0 : i32
    %c0_i32_1 = arith.constant 0 : i32
    return %arg0, %c0_i32, %c0_i32_0 : i32, i32, i32
  }
  func.func @transform_2(%arg0: i32, %arg1: i32) -> (i32, i32, i32) {
    %c0_i32 = arith.constant 0 : i32
    %c0_i32_0 = arith.constant 0 : i32
    return %arg0, %c0_i32, %arg1 : i32, i32, i32
  }
}

module attributes {stable_mosaic.version = 11 : i64} {
  func.func @_pool_excite_kernel(%arg0: i32, %arg1: i32, %arg2: memref<2x8x256xf32, #tpu.memory_space<vmem>>, %arg3: memref<8x2xf32, #tpu.memory_space<vmem>>, %arg4: memref<1x2xf32, #tpu.memory_space<vmem>>, %arg5: memref<2x8xf32, #tpu.memory_space<vmem>>, %arg6: memref<1x8xf32, #tpu.memory_space<vmem>>, %arg7: memref<2x8x1xf32, #tpu.memory_space<vmem>>, %arg8: memref<2x8x1xf32, #tpu.memory_space<vmem>>) attributes {dimension_semantics = [#tpu.dimension_semantics<parallel>, #tpu.dimension_semantics<arbitrary>], iteration_bounds = array<i64: 1, 1>, scalar_prefetch = 0 : i64, scratch_operands = 1 : i64, tpu.core_type = #tpu.core_type<tc>, window_params = [{transform_indices = @transform_0, window_bounds = array<i64: 2, 8, 256>}, {pipeline_mode = #tpu.pipeline_mode<synchronous>, transform_indices = @transform_1, window_bounds = array<i64: 8, 2>}, {pipeline_mode = #tpu.pipeline_mode<synchronous>, transform_indices = @transform_2, window_bounds = array<i64: 1, 2>}, {pipeline_mode = #tpu.pipeline_mode<synchronous>, transform_indices = @transform_3, window_bounds = array<i64: 2, 8>}, {pipeline_mode = #tpu.pipeline_mode<synchronous>, transform_indices = @transform_4, window_bounds = array<i64: 1, 8>}, {transform_indices = @transform_5, window_bounds = array<i64: 2, 8, 1>}]} {
    %c0_i32 = arith.constant 0 : i32
    %0 = arith.cmpi eq, %arg1, %c0_i32 : i32
    %1 = arith.extui %0 : i1 to i32
    %c0_i32_0 = arith.constant 0 : i32
    %2 = arith.cmpi ne, %1, %c0_i32_0 : i32
    scf.if %2 {
      %cst_11 = arith.constant 0.000000e+00 : f32
      %12 = vector.broadcast %cst_11 : f32 to vector<2x8x1xf32>
      %c0_12 = arith.constant 0 : index
      %c0_13 = arith.constant 0 : index
      %c0_14 = arith.constant 0 : index
      %13 = vector.load %arg8[%c0_12, %c0_13, %c0_14] : memref<2x8x1xf32, #tpu.memory_space<vmem>>, vector<2x8x1xf32>
      tpu.vector_store %arg8[%c0_12, %c0_13, %c0_14], %12 {strides = array<i32>} : memref<2x8x1xf32, #tpu.memory_space<vmem>>, vector<2x8x1xf32>,
    } else {
    }
    %c0 = arith.constant 0 : index
    %c0_1 = arith.constant 0 : index
    %c0_2 = arith.constant 0 : index
    %3 = vector.load %arg8[%c0, %c0_1, %c0_2] : memref<2x8x1xf32, #tpu.memory_space<vmem>>, vector<2x8x1xf32>
    %c0_3 = arith.constant 0 : index
    %c0_4 = arith.constant 0 : index
    %c0_5 = arith.constant 0 : index
    %4 = vector.load %arg2[%c0_3, %c0_4, %c0_5] : memref<2x8x256xf32, #tpu.memory_space<vmem>>, vector<2x8x256xf32>
    %cst = arith.constant dense<0.000000e+00> : vector<2x8xf32>
    %5 = vector.multi_reduction <add>, %4, %cst [2] : vector<2x8x256xf32> to vector<2x8xf32>
    %6 = vector.shape_cast %5 : vector<2x8xf32> to vector<2x8x1xf32>
    %7 = arith.addf %3, %6 : vector<2x8x1xf32>
    %c0_6 = arith.constant 0 : index
    %c0_7 = arith.constant 0 : index
    %c0_8 = arith.constant 0 : index
    %8 = vector.load %arg8[%c0_6, %c0_7, %c0_8] : memref<2x8x1xf32, #tpu.memory_space<vmem>>, vector<2x8x1xf32>
    tpu.vector_store %arg8[%c0_6, %c0_7, %c0_8], %7 {strides = array<i32>} : memref<2x8x1xf32, #tpu.memory_space<vmem>>, vector<2x8x1xf32>,
    %c0_i32_9 = arith.constant 0 : i32
    %9 = arith.cmpi eq, %arg1, %c0_i32_9 : i32
    %10 = arith.extui %9 : i1 to i32
    %c0_i32_10 = arith.constant 0 : i32
    %11 = arith.cmpi ne, %10, %c0_i32_10 : i32
    scf.if %11 {
      %c0_11 = arith.constant 0 : index
      %c0_12 = arith.constant 0 : index
      %c0_13 = arith.constant 0 : index
      %12 = vector.load %arg8[%c0_11, %c0_12, %c0_13] : memref<2x8x1xf32, #tpu.memory_space<vmem>>, vector<2x8x1xf32>
      %13 = vector.shape_cast %12 : vector<2x8x1xf32> to vector<2x8xf32>
      %cst_14 = arith.constant 3.906250e-03 : f32
      %14 = vector.broadcast %cst_14 : f32 to vector<2x8xf32>
      %15 = arith.mulf %13, %14 : vector<2x8xf32>
      %c0_15 = arith.constant 0 : index
      %c0_16 = arith.constant 0 : index
      %16 = vector.load %arg3[%c0_15, %c0_16] : memref<8x2xf32, #tpu.memory_space<vmem>>, vector<8x2xf32>
      %cst_17 = arith.constant dense<0.000000e+00> : vector<2x2xf32>
      %17 = tpu.matmul %15, %16, %cst_17 {dimension_numbers = #tpu.dot_dimension_numbers<[1], [0], [0], [1], [0, 0, 1, 1], [], []>} : vector<2x8xf32>, vector<8x2xf32>, vector<2x2xf32> -> vector<2x2xf32>
      %c0_18 = arith.constant 0 : index
      %c0_19 = arith.constant 0 : index
      %18 = vector.load %arg4[%c0_18, %c0_19] : memref<1x2xf32, #tpu.memory_space<vmem>>, vector<1x2xf32>
      %19 = vector.broadcast %18 : vector<1x2xf32> to vector<2x2xf32>
      %20 = arith.addf %17, %19 : vector<2x2xf32>
      %cst_20 = arith.constant 0.000000e+00 : f32
      %21 = vector.broadcast %cst_20 : f32 to vector<2x2xf32>
      %22 = arith.maximumf %20, %21 : vector<2x2xf32>
      %c0_21 = arith.constant 0 : index
      %c0_22 = arith.constant 0 : index
      %23 = vector.load %arg5[%c0_21, %c0_22] : memref<2x8xf32, #tpu.memory_space<vmem>>, vector<2x8xf32>
      %cst_23 = arith.constant dense<0.000000e+00> : vector<2x8xf32>
      %24 = tpu.matmul %22, %23, %cst_23 {dimension_numbers = #tpu.dot_dimension_numbers<[1], [0], [0], [1], [0, 0, 1, 1], [], []>} : vector<2x2xf32>, vector<2x8xf32>, vector<2x8xf32> -> vector<2x8xf32>
      %c0_24 = arith.constant 0 : index
      %c0_25 = arith.constant 0 : index
      %25 = vector.load %arg6[%c0_24, %c0_25] : memref<1x8xf32, #tpu.memory_space<vmem>>, vector<1x8xf32>
      %26 = vector.broadcast %25 : vector<1x8xf32> to vector<2x8xf32>
      %27 = arith.addf %24, %26 : vector<2x8xf32>
      %cst_26 = arith.constant 3.000000e+00 : f32
      %28 = vector.broadcast %cst_26 : f32 to vector<2x8xf32>
      %29 = arith.addf %27, %28 : vector<2x8xf32>
      %cst_27 = arith.constant 0.000000e+00 : f32
      %cst_28 = arith.constant 6.000000e+00 : f32
      %30 = vector.broadcast %cst_27 : f32 to vector<2x8xf32>
      %31 = arith.maximumf %30, %29 : vector<2x8xf32>
      %32 = vector.broadcast %cst_28 : f32 to vector<2x8xf32>
      %33 = arith.minimumf %32, %31 : vector<2x8xf32>
      %cst_29 = arith.constant 0.166666672 : f32
      %34 = vector.broadcast %cst_29 : f32 to vector<2x8xf32>
      %35 = arith.mulf %33, %34 : vector<2x8xf32>
      %36 = vector.shape_cast %35 : vector<2x8xf32> to vector<2x8x1xf32>
      %c0_30 = arith.constant 0 : index
      %c0_31 = arith.constant 0 : index
      %c0_32 = arith.constant 0 : index
      %37 = vector.load %arg7[%c0_30, %c0_31, %c0_32] : memref<2x8x1xf32, #tpu.memory_space<vmem>>, vector<2x8x1xf32>
      tpu.vector_store %arg7[%c0_30, %c0_31, %c0_32], %36 {strides = array<i32>} : memref<2x8x1xf32, #tpu.memory_space<vmem>>, vector<2x8x1xf32>,
    } else {
    }
    return
  }
  func.func @transform_0(%arg0: i32, %arg1: i32) -> (i32, i32, i32) {
    %c0_i32 = arith.constant 0 : i32
    %c0_i32_0 = arith.constant 0 : i32
    return %arg0, %c0_i32, %arg1 : i32, i32, i32
  }
  func.func @transform_1(%arg0: i32, %arg1: i32) -> (i32, i32) {
    %c0_i32 = arith.constant 0 : i32
    %c0_i32_0 = arith.constant 0 : i32
    %c0_i32_1 = arith.constant 0 : i32
    return %c0_i32, %c0_i32_0 : i32, i32
  }
  func.func @transform_2(%arg0: i32, %arg1: i32) -> (i32, i32) {
    %c0_i32 = arith.constant 0 : i32
    %c0_i32_0 = arith.constant 0 : i32
    %c0_i32_1 = arith.constant 0 : i32
    return %c0_i32, %c0_i32_0 : i32, i32
  }
  func.func @transform_3(%arg0: i32, %arg1: i32) -> (i32, i32) {
    %c0_i32 = arith.constant 0 : i32
    %c0_i32_0 = arith.constant 0 : i32
    %c0_i32_1 = arith.constant 0 : i32
    return %c0_i32, %c0_i32_0 : i32, i32
  }
  func.func @transform_4(%arg0: i32, %arg1: i32) -> (i32, i32) {
    %c0_i32 = arith.constant 0 : i32
    %c0_i32_0 = arith.constant 0 : i32
    %c0_i32_1 = arith.constant 0 : i32
    return %c0_i32, %c0_i32_0 : i32, i32
  }
  func.func @transform_5(%arg0: i32, %arg1: i32) -> (i32, i32, i32) {
    %c0_i32 = arith.constant 0 : i32
    %c0_i32_0 = arith.constant 0 : i32
    %c0_i32_1 = arith.constant 0 : i32
    return %arg0, %c0_i32, %c0_i32_0 : i32, i32, i32
  }
}

</mosaic_0001>

<bundles_post_ra>
// kernel: se_block.3
= control target key start
LH: loop header
LB: loop body
LE: loop exit
PB: predicated region body
PF: predicated region fallthrough
CT: control target
= control target key end

     0   :  { %v41_v0 = vmov 0   ;;  %s87_s1 = inlined_call_operand.vmem [shape: f32[2,8,1], index: 1, kind: input, shape index: {}]   ;;  %s88_s0 = inlined_call_operand.vmem [shape: f32[2,8,256], index: 0, kind: input, shape index: {}]   ;;  %s89_s2 = inlined_call_operand.vmem [shape: f32[2,8,256], index: 2, kind: output, shape index: {}]  }
   0x1   :  { %40 = vset.pattern.permute.xlu0 %v41_v0  ;;  %v11_v1 = vld [vmem:[%s87_s1] sm:$0xff]  ;;  %v12_v2 = vld [vmem:[%s87_s1 + $0x8] sm:$0xff]  ;;  %v15_v8 = vld [vmem:[%s88_s0 + $0x10] sm:$0xff] }
   0x2   :  { %19 = vperm.xlu0 %40, %v11_v1   ;;  %v13_v3 = vld [vmem:[%s88_s0] sm:$0xff]  ;;  %v14_v4 = vld [vmem:[%s88_s0 + $0x8] sm:$0xff]  ;;  %v16_v9 = vld [vmem:[%s88_s0 + $0x18] sm:$0xff] }
   0x6   :  { %24 = vperm.xlu0 %40, %v12_v2  }
  0x81   :  { %v20_v5 = vpop.permute.xlu0 %19 }
  0x82   :  { %v27_v6 = vmul.f32 %v20_v5, %v13_v3  ;;  %v28_v7 = vmul.f32 %v20_v5, %v14_v4 }
  0x84   :  { %31 = vst [vmem:[%s89_s2] sm:$0xff] %v27_v6  ;;  %32 = vst [vmem:[%s89_s2 + $0x8] sm:$0xff] %v28_v7 }
  0x85   :  { %v25_v10 = vpop.permute.xlu0 %24 }
  0x86   :  { %v29_v11 = vmul.f32 %v25_v10, %v15_v8  ;;  %v30_v12 = vmul.f32 %v25_v10, %v16_v9 }
  0x88   :  { %33 = vst [vmem:[%s89_s2 + $0x10] sm:$0xff] %v29_v11  ;;  %34 = vst [vmem:[%s89_s2 + $0x18] sm:$0xff] %v30_v12 }

// kernel: se_block.2
= control target key start
LH: loop header
LB: loop body
LE: loop exit
PB: predicated region body
PF: predicated region fallthrough
CT: control target
= control target key end

     0   :  { %vm24_vm0 = vcmask 7168   ;;  %v287_v3 = vmov 0.0   ;;  %v288_v7 = vmov 0   ;;  %vm289_vm1 = vmmov 0   ;;  %s356_s0 = inlined_call_operand.vmem [shape: f32[2,8,256], index: 0, kind: input, shape index: {}]   ;;  %s357_s1 = inlined_call_operand.vmem [shape: f32[8,2], index: 1, kind: input, shape index: {}]   ;;  %s358_s3 = inlined_call_operand.vmem [shape: f32[2,8], index: 3, kind: input, shape index: {}]   ;;  %s359_s2 = inlined_call_operand.vmem [shape: f32[1,2], index: 2, kind: input, shape index: {}]   ;;  %s360_s4 = inlined_call_operand.vmem [shape: f32[1,8], index: 4, kind: input, shape index: {}]   ;;  %s361_s5 = inlined_call_operand.vmem [shape: f32[2,8,1], index: 5, kind: output, shape index: {}]  }
   0x1   :  { %v29_v0 = vld [vmem:[%s356_s0] sm:$0xff]  ;;  %v30_v1 = vld [vmem:[%s356_s0 + $0x8] sm:$0xff]  ;;  %v31_v2 = vld [vmem:[%s356_s0 + $0x10] sm:$0xff]  ;;  %25 = vst.msk [vmem:[#allocation2] sm:$0xff] %vm24_vm0, %v287_v3  ;;  %272 = vmatprep.subr.mxu0 %v287_v3  ;;  %277 = vmatprep.subr.mxu1 %v287_v3  ;;  %v67_v19 = vlaneseq  ;;  %vm77_vm2 = vcmask 1041409   ;;  %vm79_vm3 = vcmask 64512  }
   0x2   :  { %26 = vst.msk [vmem:[#allocation2 + $0x8] sm:$0xff] %vm24_vm0, %v287_v3  ;;  %v33_v4 = vadd.f32 %v30_v1, %v29_v0  ;;  %v32_v5 = vld [vmem:[%s356_s0 + $0x18] sm:$0xff]  ;;  %285 = vset.pattern.permute.xlu1 %v288_v7  ;;  %286 = vset.pattern.permute.xlu0 %v288_v7  ;;  %v51_v18 = vld [vmem:[%s357_s1] sm:$0xff]  ;;  %vm165_vm4 = vcmask 1041408   ;;  %vm161_vm5 = vcmask 15360  }
   0x3   :  { %v36_v6 = vadd.f32 %v32_v5, %v31_v2  ;;  %274 = vmatprep.mubr.msk.f32.mxu0 %vm289_vm1, %v287_v3  ;;  %279 = vmatprep.mubr.msk.f32.mxu1 %vm289_vm1, %v287_v3  ;;  %v68_v20 = vand.u32 127, %v67_v19  ;;  %v70_v21 = vshrl.u32 %v67_v19, 7  ;;  %v153_v28 = vld [vmem:[%s358_s3] sm:$0x3] }
   0x4   :  { %34 = vadd.xlane.f32.xlu0 %v33_v4  ;;  %273 = vmatpush3.msra.mxu0 %v51_v18  ;;  %v263_v29 = vld [vmem:[%s359_s2] ss:$0 sm:$0xff] }
   0x5   :  { %v71_v23 = vsub.s32 %v68_v20, %v70_v21  ;;  %278 = vmatpush3.msk.msra.mxu1 %vm165_vm4, %v153_v28  ;;  %v265_v34 = vld [vmem:[%s360_s4] ss:$0 sm:$0xff]  ;;  %v252_v41 = vsub.s32 1, %v70_v21  ;;  %v245_v42 = vsub.s32 0, %v70_v21 }
   0x8   :  { %37 = vadd.xlane.f32.xlu0 %v36_v6  ;;  %v27_v8 = vld [vmem:[#allocation2] sm:$0xff] }
   0x9   :  { %v28_v11 = vld [vmem:[#allocation2 + $0x8] sm:$0xff] }
  0x91   :  { %v35_v9 = vpop.xlane.xlu0 %34 }
  0x92   :  { %v39_v10 = vadd.f32 %v35_v9, %v27_v8 }
  0x94   :  { %42 = vst.msk [vmem:[#allocation2] sm:$0xff] %vm24_vm0, %v39_v10 }
  0x95   :  { %v38_v12 = vpop.xlane.xlu0 %37 }
  0x96   :  { %v40_v13 = vadd.f32 %v38_v12, %v28_v11 }
  0x98   :  { %43 = vst.msk [vmem:[#allocation2 + $0x8] sm:$0xff] %vm24_vm0, %v40_v13 }
  0x9b   :  { %v47_v14 = vld [vmem:[#allocation2] sm:$0xff] }
  0x9c   :  { %v49_v15 = vmul.f32 0.00390625, %v47_v14 }
  0x9e   :  { %62 = vperm.xlu1 %285, %v49_v15  }
  0x9f   :  { %v48_v16 = vld [vmem:[#allocation2 + $0x8] sm:$0xff] }
  0xa0   :  { %v50_v17 = vmul.f32 0.00390625, %v48_v16 }
  0xa2   :  { %65 = vperm.xlu1 %285, %v50_v17  }
 0x11d   :  { %v63_v22 = vpop.permute.xlu1 %62 }
 0x11e   :  { %v72_v25 = vrot.slane %v63_v22, %v71_v23 }
 0x121   :  { %v66_v24 = vpop.permute.xlu1 %65 }
 0x122   :  { %v76_v26 = vrot.slane %v66_v24, %v71_v23 }
 0x124   :  { %v78_v27 = vsel %vm77_vm2, %v76_v26, %v72_v25 }
 0x125   :  { %275 = vmatmul.mubr.msk.f32.vlgmr.msra.gmra.mrb[0].mxu0 %vm79_vm3, %v78_v27 }
 0x1f8   :  { %v148_v30 = vpop.f32.mrb[0].mxu0 }
 0x1f9   :  { %v149_v31 = vadd.f32 %v263_v29, %v148_v30  ;;  %v276_v32 = vpop.f32.mrb[1].mxu0 }
 0x1fb   :  { %v152_v33 = vmax.f32 %v149_v31, 0.0 }
 0x1fd   :  { %280 = vmatmul.mubr.msk.f32.vlgmr.msra.gmra.mrb[0].mxu1 %vm161_vm5, %v152_v33 }
 0x2d0   :  { %v235_v35 = vpop.f32.mrb[0].mxu1 }
 0x2d1   :  { %v236_v36 = vadd.f32 %v265_v34, %v235_v35  ;;  %v281_v37 = vpop.f32.mrb[1].mxu1 }
 0x2d3   :  { %v239_v38 = vadd.f32 3.0, %v236_v36 }
 0x2d5   :  { %v240_v39 = vmax.f32 %v239_v38, 0.0 }
 0x2d7   :  { %v241_v40 = vmin.f32 %v240_v39, 6.0 }
 0x2d9   :  { %v242_v43 = vmul.f32 0.16666667, %v241_v40 }
 0x2db   :  { %v253_v44 = vrot.slane %v242_v43, %v252_v41  ;;  %v246_v45 = vrot.slane %v242_v43, %v245_v42 }
 0x2dd   :  { %255 = vbcast.lane.b32.xlu1 %v253_v44, 256  ;;  %248 = vbcast.lane.b32.xlu0 %v246_v45, 256 }
 0x34f   :  { %v256_v46 = vpop.permute.xlu1 %255  ;;  %v249_v47 = vpop.permute.xlu0 %248 }
 0x350   :  { %258 = vst.msk [vmem:[%s361_s5 + $0x8] sm:$0xff] %vm24_vm0, %v256_v46  ;;  %257 = vst.msk [vmem:[%s361_s5] sm:$0xff] %vm24_vm0, %v249_v47 }

</bundles_post_ra>
